<compile_context>
chip_gen: v5e
topology: v5e:2x2
jax: 0.10.0
libtpu: 0.0.40
codegen_flags: <defaults>
</compile_context>

<pallas_src>
import functools

import jax
import jax.numpy as jnp
from jax.experimental import pallas as pl
from jax.experimental.pallas import tpu as pltpu


def _instance_norm_flat(yf, gamma, beta, batch_block, seq, eps=1e-5):
    # yf: (M, E) with M = batch_block * seq, viewed as (batch_block, seq, E).
    # torch InstanceNorm1d on (B, E, N): normalize over the sequence dim per
    # channel, biased variance, eps=1e-5, affine.
    M, E = yf.shape
    y = yf.reshape(batch_block, seq, E)
    mean = jnp.mean(y, axis=1, keepdims=True)          # (Bb, 1, E)
    msq = jnp.mean(y * y, axis=1, keepdims=True)       # (Bb, 1, E)
    var = msq - mean * mean                            # single-pass variance
    out = gamma * ((y - mean) * jax.lax.rsqrt(var + eps)) + beta
    return out.reshape(M, E)


# -----------------------------------------------------------------------------
# Kernel: one grid step == one block of Bb batch elements; whole layer inside.
# -----------------------------------------------------------------------------
def attention_layer_kernel(x_ref, wqkv_ref, wc_ref, w1_ref, w2_ref, vec_ref,
                           o_ref, *, head_num, qkv_dim):
    H, D = head_num, qkv_dim
    Bb, N, E = x_ref.shape
    M = Bb * N

    x = x_ref[...]                                     # (Bb, N, E)
    xf = x.reshape(M, E)                               # free leading-dim merge

    # ---- fused QKV projection, ONE matmul for the whole block (M columns) --
    # wqkv: (3*H*D, E); attention scale pre-folded into the Q rows.
    qkv_t = jax.lax.dot_general(
        wqkv_ref[...], xf, (((1,), (1,)), ((), ())),
        preferred_element_type=jnp.float32)            # (3HD, M)

    # ---- packed bias / affine slab (single DMA) ----
    vecs = vec_ref[...]                                # (8, 2E)
    bc  = vecs[0:1, :E]
    g1  = vecs[1:2, :E]
    be1 = vecs[2:3, :E]
    bb1 = vecs[3:4, :]                                 # (1, 2E)
    bb2 = vecs[4:5, :E]
    g2  = vecs[5:6, :E]
    be2 = vecs[6:7, :E]

    # ---- multi-head attention per batch element (Bb is tiny & static) ----
    mho_parts = []
    for b in range(Bb):                                # unrolled Python loop
        # Per-element columns; leading-dim reshape to head-major is free.
        qkv_b = qkv_t[:, b * N:(b + 1) * N].reshape(3 * H, D, N)
        q = qkv_b[0:H]                                 # (H, D, N) scale folded
        k = qkv_b[H:2 * H]                             # (H, D, N)
        v = qkv_b[2 * H:3 * H]                         # (H, D, N)

        # score[h,n,m] = sum_d q[h,d,n] * k[h,d,m]  (no transpose of q needed)
        score = jax.lax.dot_general(
            q, k, (((1,), (1,)), ((0,), (0,))),
            preferred_element_type=jnp.float32)        # (H, N, N)
        score = score - jnp.max(score, axis=-1, keepdims=True)
        p = jnp.exp(score)
        p = p * pl.reciprocal(jnp.sum(p, axis=-1, keepdims=True), approx=False)

        # out[h,n,d] = sum_m p[h,n,m] * v[h,d,m]
        out = jax.lax.dot_general(
            p, v, (((2,), (2,)), ((0,), (0,))),
            preferred_element_type=jnp.float32)        # (H, N, D)

        # multi_head_combine: batched per-head matmul + major-axis sum over H
        mho_h = jax.lax.dot_general(
            out, wc_ref[...], (((2,), (1,)), ((0,), (0,))),
            preferred_element_type=jnp.float32)        # (H, N, E)
        mho_parts.append(jnp.sum(mho_h, axis=0))       # (N, E)

    mho = mho_parts[0] if Bb == 1 else jnp.concatenate(mho_parts, axis=0)
    mho = mho + bc                                     # (M, E)

    # ---- Add & InstanceNorm 1 ----
    out1 = _instance_norm_flat(xf + mho, g1, be1, Bb, N)          # (M, E)

    # ---- FeedForward: W2(relu(W1(out1))), batched over M = Bb*N rows ----
    h1 = jnp.dot(out1, w1_ref[...],
                 preferred_element_type=jnp.float32) + bb1        # (M, 2E)
    h1 = jnp.maximum(h1, 0.0)
    out2 = jnp.dot(h1, w2_ref[...],
                   preferred_element_type=jnp.float32) + bb2      # (M, E)

    # ---- Add & InstanceNorm 2 ----
    out3 = _instance_norm_flat(out1 + out2, g2, be2, Bb, N)       # (M, E)

    o_ref[...] = out3.reshape(Bb, N, E).astype(o_ref.dtype)


# -----------------------------------------------------------------------------
# Host-side one-time parameter transform (weight fusion / repacking).
# -----------------------------------------------------------------------------
def prepare_kernel_params(params, *, head_num, qkv_dim):
    (wq, wk, wv, wc, bc, g1, be1, w1, bb1, w2, bb2, g2, be2) = params
    E = wq.shape[0]
    FF = w1.shape[1]
    scale = 1.0 / (qkv_dim ** 0.5)

    # Fused QKV weight, (3*H*D, E); attention scale folded into the Q block.
    wqkv = jnp.concatenate([wq.T * scale, wk.T, wv.T], axis=0)
    # Combine weight stored head-major: (H, D, E).
    wc_hde = wc.reshape(head_num, qkv_dim, E)

    # Pack all bias / affine vectors into one (8, FF) slab.
    vecs = jnp.zeros((8, FF), jnp.float32)
    vecs = vecs.at[0, :E].set(bc[0])
    vecs = vecs.at[1, :E].set(g1[0])
    vecs = vecs.at[2, :E].set(be1[0])
    vecs = vecs.at[3, :].set(bb1[0])
    vecs = vecs.at[4, :E].set(bb2[0])
    vecs = vecs.at[5, :E].set(g2[0])
    vecs = vecs.at[6, :E].set(be2[0])

    return (wqkv, wc_hde, w1, w2, vecs)


def attention_layer_pallas(x, kparams, *, head_num, qkv_dim, num_blocks=None):
    B, N, E = x.shape
    HD = head_num * qkv_dim
    FF = 2 * E
    wqkv, wc_hde, w1, w2, vecs = kparams

    if num_blocks is None:
        # >=2 blocks so both v7x TensorCores get work; on single-TC v5e/v6e
        # this is still far fewer grid steps than grid=(B,).
        num_blocks = min(B, 2)
    assert B % num_blocks == 0, "batch must divide evenly into blocks"
    Bb = B // num_blocks

    def full_spec(shape):
        # Weight blocks: whole array, invariant across grid steps.
        return pl.BlockSpec(shape, lambda g, n=len(shape): (0,) * n)

    kernel = functools.partial(attention_layer_kernel,
                               head_num=head_num, qkv_dim=qkv_dim)

    return pl.pallas_call(
        kernel,
        out_shape=jax.ShapeDtypeStruct((B, N, E), x.dtype),
        grid_spec=pltpu.PrefetchScalarGridSpec(
            num_scalar_prefetch=0,
            grid=(num_blocks,),
            in_specs=[
                pl.BlockSpec((Bb, N, E), lambda g: (g, 0, 0)),   # x block
                full_spec((3 * HD, E)),                          # fused Wqkv
                full_spec((head_num, qkv_dim, E)),               # Wcombine
                full_spec((E, FF)),                              # FF W1
                full_spec((FF, E)),                              # FF W2
                full_spec((8, FF)),                              # packed biases
            ],
            out_specs=pl.BlockSpec((Bb, N, E), lambda g: (g, 0, 0)),
        ),
        compiler_params=pltpu.CompilerParams(
            dimension_semantics=("parallel",),
            vmem_limit_bytes=32 * 1024 * 1024),
    )(x, wqkv, wc_hde, w1, w2, vecs)


# -----------------------------------------------------------------------------
# Pure-JAX reference (mirrors the PyTorch forward exactly) for validation.
# -----------------------------------------------------------------------------
def attention_layer_ref(x, params, *, head_num, qkv_dim):
    (wq, wk, wv, wc, bc, g1, be1, w1, bb1, w2, bb2, g2, be2) = params
    B, N, E = x.shape
    D = qkv_dim

    def heads(t):  # (B, N, H*D) -> (B, H, N, D)
        return t.reshape(B, N, head_num, D).transpose(0, 2, 1, 3)

    q, k, v = heads(x @ wq), heads(x @ wk), heads(x @ wv)
    score = jnp.einsum('bhnd,bhmd->bhnm', q, k) / jnp.sqrt(jnp.float32(D))
    w = jax.nn.softmax(score, axis=-1)
    out = jnp.einsum('bhnm,bhmd->bhnd', w, v)
    out_concat = out.transpose(0, 2, 1, 3).reshape(B, N, head_num * D)
    mho = out_concat @ wc + bc

    def inorm(t, gamma, beta, eps=1e-5):
        mean = jnp.mean(t, axis=1, keepdims=True)
        var = jnp.mean((t - mean) ** 2, axis=1, keepdims=True)
        return gamma * (t - mean) / jnp.sqrt(var + eps) + beta

    out1 = inorm(x + mho, g1, be1)
    out2 = jnp.maximum(out1 @ w1 + bb1, 0.0) @ w2 + bb2
    return inorm(out1 + out2, g2, be2)


# -----------------------------------------------------------------------------
# Main
# -----------------------------------------------------------------------------
if __name__ == "__main__":
    B, N = 4, 8                      # batch, seq (B=4 exercises Bb=2 blocks)
    E, H, D = 32, 4, 8               # embedding_dim, head_num, qkv_dim
    HD, FF = H * D, 2 * E

    key = jax.random.PRNGKey(0)
    ks = jax.random.split(key, 16)

    def uinit(k, shape, fan_in):
        bound = 1.0 / (fan_in ** 0.5)
        return jax.random.uniform(k, shape, jnp.float32, -bound, bound)

    x = jax.random.normal(ks[0], (B, N, E), jnp.float32)

    wq = uinit(ks[1], (E, HD), E)
    wk = uinit(ks[2], (E, HD), E)
    wv = uinit(ks[3], (E, HD), E)
    wc = uinit(ks[4], (HD, E), HD)
    bc = uinit(ks[5], (1, E), HD)
    g1 = 1.0 + 0.1 * jax.random.normal(ks[6], (1, E), jnp.float32)   # norm1 affine
    be1 = 0.1 * jax.random.normal(ks[7], (1, E), jnp.float32)
    w1 = uinit(ks[8], (E, FF), E)
    bb1 = uinit(ks[9], (1, FF), E)
    w2 = uinit(ks[10], (FF, E), FF)
    bb2 = uinit(ks[11], (1, E), FF)
    g2 = 1.0 + 0.1 * jax.random.normal(ks[12], (1, E), jnp.float32)  # norm2 affine
    be2 = 0.1 * jax.random.normal(ks[13], (1, E), jnp.float32)

    params = (wq, wk, wv, wc, bc, g1, be1, w1, bb1, w2, bb2, g2, be2)
    kparams = prepare_kernel_params(params, head_num=H, qkv_dim=D)

    out = attention_layer_pallas(x, kparams, head_num=H, qkv_dim=D)
    out = jax.block_until_ready(out)

    ref = attention_layer_ref(x, params, head_num=H, qkv_dim=D)
    assert out.shape == (B, N, E)
    # Exact softmax reciprocal now; tolerance kept at 5e-3 only to cover
    # MXU default-precision accumulation-order differences vs. the XLA path.
    assert jnp.allclose(out, ref, atol=5e-3, rtol=5e-3), (
        f"max abs err = {jnp.max(jnp.abs(out - ref))}")

    print("KERNEL_OK")
</pallas_src>

<mosaic_0001>
module attributes {stable_mosaic.version = 11 : i64} {
  func.func @attention_layer_kernel(%arg0: i32, %arg1: memref<2x8x32xf32, #tpu.memory_space<vmem>>, %arg2: memref<96x32xf32, #tpu.memory_space<vmem>>, %arg3: memref<4x8x32xf32, #tpu.memory_space<vmem>>, %arg4: memref<32x64xf32, #tpu.memory_space<vmem>>, %arg5: memref<64x32xf32, #tpu.memory_space<vmem>>, %arg6: memref<8x64xf32, #tpu.memory_space<vmem>>, %arg7: memref<2x8x32xf32, #tpu.memory_space<vmem>>) attributes {dimension_semantics = [#tpu.dimension_semantics<parallel>], iteration_bounds = array<i64: 2>, scalar_prefetch = 0 : i64, scratch_operands = 0 : i64, tpu.core_type = #tpu.core_type<tc>, window_params = [{transform_indices = @transform_0, window_bounds = array<i64: 2, 8, 32>}, {pipeline_mode = #tpu.pipeline_mode<synchronous>, transform_indices = @transform_1, window_bounds = array<i64: 96, 32>}, {pipeline_mode = #tpu.pipeline_mode<synchronous>, transform_indices = @transform_2, window_bounds = array<i64: 4, 8, 32>}, {pipeline_mode = #tpu.pipeline_mode<synchronous>, transform_indices = @transform_3, window_bounds = array<i64: 32, 64>}, {pipeline_mode = #tpu.pipeline_mode<synchronous>, transform_indices = @transform_4, window_bounds = array<i64: 64, 32>}, {pipeline_mode = #tpu.pipeline_mode<synchronous>, transform_indices = @transform_5, window_bounds = array<i64: 8, 64>}, {transform_indices = @transform_6, window_bounds = array<i64: 2, 8, 32>}]} {
    %c0 = arith.constant 0 : index
    %c0_0 = arith.constant 0 : index
    %c0_1 = arith.constant 0 : index
    %0 = vector.load %arg1[%c0, %c0_0, %c0_1] : memref<2x8x32xf32, #tpu.memory_space<vmem>>, vector<2x8x32xf32>
    %1 = vector.shape_cast %0 : vector<2x8x32xf32> to vector<16x32xf32>
    %c0_2 = arith.constant 0 : index
    %c0_3 = arith.constant 0 : index
    %2 = vector.load %arg2[%c0_2, %c0_3] : memref<96x32xf32, #tpu.memory_space<vmem>>, vector<96x32xf32>
    %cst = arith.constant dense<0.000000e+00> : vector<96x16xf32>
    %3 = tpu.matmul %2, %1, %cst {dimension_numbers = #tpu.dot_dimension_numbers<[1], [1], [0], [0], [0, 0, 1, 0], [], []>} : vector<96x32xf32>, vector<16x32xf32>, vector<96x16xf32> -> vector<96x16xf32>
    %c0_4 = arith.constant 0 : index
    %c0_5 = arith.constant 0 : index
    %4 = vector.load %arg6[%c0_4, %c0_5] : memref<8x64xf32, #tpu.memory_space<vmem>>, vector<8x64xf32>
    %5 = vector.extract_strided_slice %4 {offsets = [0, 0], sizes = [1, 32], strides = [1, 1]} : vector<8x64xf32> to vector<1x32xf32>
    %6 = vector.extract_strided_slice %4 {offsets = [1, 0], sizes = [1, 32], strides = [1, 1]} : vector<8x64xf32> to vector<1x32xf32>
    %7 = vector.extract_strided_slice %4 {offsets = [2, 0], sizes = [1, 32], strides = [1, 1]} : vector<8x64xf32> to vector<1x32xf32>
    %8 = vector.extract_strided_slice %4 {offsets = [3, 0], sizes = [1, 64], strides = [1, 1]} : vector<8x64xf32> to vector<1x64xf32>
    %9 = vector.extract_strided_slice %4 {offsets = [4, 0], sizes = [1, 32], strides = [1, 1]} : vector<8x64xf32> to vector<1x32xf32>
    %10 = vector.extract_strided_slice %4 {offsets = [5, 0], sizes = [1, 32], strides = [1, 1]} : vector<8x64xf32> to vector<1x32xf32>
    %11 = vector.extract_strided_slice %4 {offsets = [6, 0], sizes = [1, 32], strides = [1, 1]} : vector<8x64xf32> to vector<1x32xf32>
    %12 = vector.extract_strided_slice %3 {offsets = [0, 0], sizes = [96, 8], strides = [1, 1]} : vector<96x16xf32> to vector<96x8xf32>
    %13 = vector.shape_cast %12 : vector<96x8xf32> to vector<12x8x8xf32>
    %14 = vector.extract_strided_slice %13 {offsets = [0, 0, 0], sizes = [4, 8, 8], strides = [1, 1, 1]} : vector<12x8x8xf32> to vector<4x8x8xf32>
    %15 = vector.extract_strided_slice %13 {offsets = [4, 0, 0], sizes = [4, 8, 8], strides = [1, 1, 1]} : vector<12x8x8xf32> to vector<4x8x8xf32>
    %16 = vector.extract_strided_slice %13 {offsets = [8, 0, 0], sizes = [4, 8, 8], strides = [1, 1, 1]} : vector<12x8x8xf32> to vector<4x8x8xf32>
    %cst_6 = arith.constant dense<0.000000e+00> : vector<4x8x8xf32>
    %17 = tpu.matmul %14, %15, %cst_6 {dimension_numbers = #tpu.dot_dimension_numbers<[1], [1], [2], [2], [0, 0, 0, 2, 1, 2], [0], [0]>} : vector<4x8x8xf32>, vector<4x8x8xf32>, vector<4x8x8xf32> -> vector<4x8x8xf32>
    %cst_7 = arith.constant dense<0xFF800000> : vector<4x8xf32>
    %18 = vector.multi_reduction <maximumf>, %17, %cst_7 [2] : vector<4x8x8xf32> to vector<4x8xf32>
    %19 = vector.shape_cast %18 : vector<4x8xf32> to vector<4x8x1xf32>
    %20 = vector.broadcast %19 : vector<4x8x1xf32> to vector<4x8x8xf32>
    %21 = arith.subf %17, %20 : vector<4x8x8xf32>
    %22 = math.exp %21 : vector<4x8x8xf32>
    %cst_8 = arith.constant dense<0.000000e+00> : vector<4x8xf32>
    %23 = vector.multi_reduction <add>, %22, %cst_8 [2] : vector<4x8x8xf32> to vector<4x8xf32>
    %24 = vector.shape_cast %23 : vector<4x8xf32> to vector<4x8x1xf32>
    %25 = tpu.reciprocal %24 : vector<4x8x1xf32> -> vector<4x8x1xf32>
    %26 = vector.broadcast %25 : vector<4x8x1xf32> to vector<4x8x8xf32>
    %27 = arith.mulf %22, %26 : vector<4x8x8xf32>
    %cst_9 = arith.constant dense<0.000000e+00> : vector<4x8x8xf32>
    %28 = tpu.matmul %27, %16, %cst_9 {dimension_numbers = #tpu.dot_dimension_numbers<[2], [2], [1], [1], [0, 0, 0, 1, 1, 1], [0], [0]>} : vector<4x8x8xf32>, vector<4x8x8xf32>, vector<4x8x8xf32> -> vector<4x8x8xf32>
    %c0_10 = arith.constant 0 : index
    %c0_11 = arith.constant 0 : index
    %c0_12 = arith.constant 0 : index
    %29 = vector.load %arg3[%c0_10, %c0_11, %c0_12] : memref<4x8x32xf32, #tpu.memory_space<vmem>>, vector<4x8x32xf32>
    %cst_13 = arith.constant dense<0.000000e+00> : vector<4x8x32xf32>
    %30 = tpu.matmul %28, %29, %cst_13 {dimension_numbers = #tpu.dot_dimension_numbers<[2], [1], [1], [2], [0, 0, 0, 1, 1, 2], [0], [0]>} : vector<4x8x8xf32>, vector<4x8x32xf32>, vector<4x8x32xf32> -> vector<4x8x32xf32>
    %cst_14 = arith.constant dense<0.000000e+00> : vector<8x32xf32>
    %31 = vector.multi_reduction <add>, %30, %cst_14 [0] : vector<4x8x32xf32> to vector<8x32xf32>
    %32 = vector.extract_strided_slice %3 {offsets = [0, 8], sizes = [96, 8], strides = [1, 1]} : vector<96x16xf32> to vector<96x8xf32>
    %33 = vector.shape_cast %32 : vector<96x8xf32> to vector<12x8x8xf32>
    %34 = vector.extract_strided_slice %33 {offsets = [0, 0, 0], sizes = [4, 8, 8], strides = [1, 1, 1]} : vector<12x8x8xf32> to vector<4x8x8xf32>
    %35 = vector.extract_strided_slice %33 {offsets = [4, 0, 0], sizes = [4, 8, 8], strides = [1, 1, 1]} : vector<12x8x8xf32> to vector<4x8x8xf32>
    %36 = vector.extract_strided_slice %33 {offsets = [8, 0, 0], sizes = [4, 8, 8], strides = [1, 1, 1]} : vector<12x8x8xf32> to vector<4x8x8xf32>
    %cst_15 = arith.constant dense<0.000000e+00> : vector<4x8x8xf32>
    %37 = tpu.matmul %34, %35, %cst_15 {dimension_numbers = #tpu.dot_dimension_numbers<[1], [1], [2], [2], [0, 0, 0, 2, 1, 2], [0], [0]>} : vector<4x8x8xf32>, vector<4x8x8xf32>, vector<4x8x8xf32> -> vector<4x8x8xf32>
    %cst_16 = arith.constant dense<0xFF800000> : vector<4x8xf32>
    %38 = vector.multi_reduction <maximumf>, %37, %cst_16 [2] : vector<4x8x8xf32> to vector<4x8xf32>
    %39 = vector.shape_cast %38 : vector<4x8xf32> to vector<4x8x1xf32>
    %40 = vector.broadcast %39 : vector<4x8x1xf32> to vector<4x8x8xf32>
    %41 = arith.subf %37, %40 : vector<4x8x8xf32>
    %42 = math.exp %41 : vector<4x8x8xf32>
    %cst_17 = arith.constant dense<0.000000e+00> : vector<4x8xf32>
    %43 = vector.multi_reduction <add>, %42, %cst_17 [2] : vector<4x8x8xf32> to vector<4x8xf32>
    %44 = vector.shape_cast %43 : vector<4x8xf32> to vector<4x8x1xf32>
    %45 = tpu.reciprocal %44 : vector<4x8x1xf32> -> vector<4x8x1xf32>
    %46 = vector.broadcast %45 : vector<4x8x1xf32> to vector<4x8x8xf32>
    %47 = arith.mulf %42, %46 : vector<4x8x8xf32>
    %cst_18 = arith.constant dense<0.000000e+00> : vector<4x8x8xf32>
    %48 = tpu.matmul %47, %36, %cst_18 {dimension_numbers = #tpu.dot_dimension_numbers<[2], [2], [1], [1], [0, 0, 0, 1, 1, 1], [0], [0]>} : vector<4x8x8xf32>, vector<4x8x8xf32>, vector<4x8x8xf32> -> vector<4x8x8xf32>
    %c0_19 = arith.constant 0 : index
    %c0_20 = arith.constant 0 : index
    %c0_21 = arith.constant 0 : index
    %49 = vector.load %arg3[%c0_19, %c0_20, %c0_21] : memref<4x8x32xf32, #tpu.memory_space<vmem>>, vector<4x8x32xf32>
    %cst_22 = arith.constant dense<0.000000e+00> : vector<4x8x32xf32>
    %50 = tpu.matmul %48, %49, %cst_22 {dimension_numbers = #tpu.dot_dimension_numbers<[2], [1], [1], [2], [0, 0, 0, 1, 1, 2], [0], [0]>} : vector<4x8x8xf32>, vector<4x8x32xf32>, vector<4x8x32xf32> -> vector<4x8x32xf32>
    %cst_23 = arith.constant dense<0.000000e+00> : vector<8x32xf32>
    %51 = vector.multi_reduction <add>, %50, %cst_23 [0] : vector<4x8x32xf32> to vector<8x32xf32>
    %52 = tpu.concatenate %31, %51 in 0 : vector<8x32xf32>, vector<8x32xf32> -> vector<16x32xf32>
    %53 = vector.broadcast %5 : vector<1x32xf32> to vector<16x32xf32>
    %54 = arith.addf %52, %53 : vector<16x32xf32>
    %55 = arith.addf %1, %54 : vector<16x32xf32>
    %56 = vector.shape_cast %55 : vector<16x32xf32> to vector<2x8x32xf32>
    %cst_24 = arith.constant dense<0.000000e+00> : vector<2x32xf32>
    %57 = vector.multi_reduction <add>, %56, %cst_24 [1] : vector<2x8x32xf32> to vector<2x32xf32>
    %58 = vector.shape_cast %57 : vector<2x32xf32> to vector<2x1x32xf32>
    %cst_25 = arith.constant 8.000000e+00 : f32
    %59 = vector.broadcast %cst_25 : f32 to vector<2x1x32xf32>
    %60 = arith.divf %58, %59 : vector<2x1x32xf32>
    %61 = arith.mulf %56, %56 : vector<2x8x32xf32>
    %cst_26 = arith.constant dense<0.000000e+00> : vector<2x32xf32>
    %62 = vector.multi_reduction <add>, %61, %cst_26 [1] : vector<2x8x32xf32> to vector<2x32xf32>
    %63 = vector.shape_cast %62 : vector<2x32xf32> to vector<2x1x32xf32>
    %cst_27 = arith.constant 8.000000e+00 : f32
    %64 = vector.broadcast %cst_27 : f32 to vector<2x1x32xf32>
    %65 = arith.divf %63, %64 : vector<2x1x32xf32>
    %66 = arith.mulf %60, %60 : vector<2x1x32xf32>
    %67 = arith.subf %65, %66 : vector<2x1x32xf32>
    %68 = vector.broadcast %60 : vector<2x1x32xf32> to vector<2x8x32xf32>
    %69 = arith.subf %56, %68 : vector<2x8x32xf32>
    %cst_28 = arith.constant 9.99999974E-6 : f32
    %70 = vector.broadcast %cst_28 : f32 to vector<2x1x32xf32>
    %71 = arith.addf %67, %70 : vector<2x1x32xf32>
    %72 = math.rsqrt %71 : vector<2x1x32xf32>
    %73 = vector.broadcast %72 : vector<2x1x32xf32> to vector<2x8x32xf32>
    %74 = arith.mulf %69, %73 : vector<2x8x32xf32>
    %75 = vector.shape_cast %6 : vector<1x32xf32> to vector<1x1x32xf32>
    %76 = vector.broadcast %75 : vector<1x1x32xf32> to vector<2x8x32xf32>
    %77 = arith.mulf %76, %74 : vector<2x8x32xf32>
    %78 = vector.shape_cast %7 : vector<1x32xf32> to vector<1x1x32xf32>
    %79 = vector.broadcast %78 : vector<1x1x32xf32> to vector<2x8x32xf32>
    %80 = arith.addf %77, %79 : vector<2x8x32xf32>
    %81 = vector.shape_cast %80 : vector<2x8x32xf32> to vector<16x32xf32>
    %c0_29 = arith.constant 0 : index
    %c0_30 = arith.constant 0 : index
    %82 = vector.load %arg4[%c0_29, %c0_30] : memref<32x64xf32, #tpu.memory_space<vmem>>, vector<32x64xf32>
    %cst_31 = arith.constant dense<0.000000e+00> : vector<16x64xf32>
    %83 = tpu.matmul %81, %82, %cst_31 {dimension_numbers = #tpu.dot_dimension_numbers<[1], [0], [0], [1], [0, 0, 1, 1], [], []>} : vector<16x32xf32>, vector<32x64xf32>, vector<16x64xf32> -> vector<16x64xf32>
    %84 = vector.broadcast %8 : vector<1x64xf32> to vector<16x64xf32>
    %85 = arith.addf %83, %84 : vector<16x64xf32>
    %cst_32 = arith.constant 0.000000e+00 : f32
    %86 = vector.broadcast %cst_32 : f32 to vector<16x64xf32>
    %87 = arith.maximumf %85, %86 : vector<16x64xf32>
    %c0_33 = arith.constant 0 : index
    %c0_34 = arith.constant 0 : index
    %88 = vector.load %arg5[%c0_33, %c0_34] : memref<64x32xf32, #tpu.memory_space<vmem>>, vector<64x32xf32>
    %cst_35 = arith.constant dense<0.000000e+00> : vector<16x32xf32>
    %89 = tpu.matmul %87, %88, %cst_35 {dimension_numbers = #tpu.dot_dimension_numbers<[1], [0], [0], [1], [0, 0, 1, 1], [], []>} : vector<16x64xf32>, vector<64x32xf32>, vector<16x32xf32> -> vector<16x32xf32>
    %90 = vector.broadcast %9 : vector<1x32xf32> to vector<16x32xf32>
    %91 = arith.addf %89, %90 : vector<16x32xf32>
    %92 = arith.addf %81, %91 : vector<16x32xf32>
    %93 = vector.shape_cast %92 : vector<16x32xf32> to vector<2x8x32xf32>
    %cst_36 = arith.constant dense<0.000000e+00> : vector<2x32xf32>
    %94 = vector.multi_reduction <add>, %93, %cst_36 [1] : vector<2x8x32xf32> to vector<2x32xf32>
    %95 = vector.shape_cast %94 : vector<2x32xf32> to vector<2x1x32xf32>
    %cst_37 = arith.constant 8.000000e+00 : f32
    %96 = vector.broadcast %cst_37 : f32 to vector<2x1x32xf32>
    %97 = arith.divf %95, %96 : vector<2x1x32xf32>
    %98 = arith.mulf %93, %93 : vector<2x8x32xf32>
    %cst_38 = arith.constant dense<0.000000e+00> : vector<2x32xf32>
    %99 = vector.multi_reduction <add>, %98, %cst_38 [1] : vector<2x8x32xf32> to vector<2x32xf32>
    %100 = vector.shape_cast %99 : vector<2x32xf32> to vector<2x1x32xf32>
    %cst_39 = arith.constant 8.000000e+00 : f32
    %101 = vector.broadcast %cst_39 : f32 to vector<2x1x32xf32>
    %102 = arith.divf %100, %101 : vector<2x1x32xf32>
    %103 = arith.mulf %97, %97 : vector<2x1x32xf32>
    %104 = arith.subf %102, %103 : vector<2x1x32xf32>
    %105 = vector.broadcast %97 : vector<2x1x32xf32> to vector<2x8x32xf32>
    %106 = arith.subf %93, %105 : vector<2x8x32xf32>
    %cst_40 = arith.constant 9.99999974E-6 : f32
    %107 = vector.broadcast %cst_40 : f32 to vector<2x1x32xf32>
    %108 = arith.addf %104, %107 : vector<2x1x32xf32>
    %109 = math.rsqrt %108 : vector<2x1x32xf32>
    %110 = vector.broadcast %109 : vector<2x1x32xf32> to vector<2x8x32xf32>
    %111 = arith.mulf %106, %110 : vector<2x8x32xf32>
    %112 = vector.shape_cast %10 : vector<1x32xf32> to vector<1x1x32xf32>
    %113 = vector.broadcast %112 : vector<1x1x32xf32> to vector<2x8x32xf32>
    %114 = arith.mulf %113, %111 : vector<2x8x32xf32>
    %115 = vector.shape_cast %11 : vector<1x32xf32> to vector<1x1x32xf32>
    %116 = vector.broadcast %115 : vector<1x1x32xf32> to vector<2x8x32xf32>
    %117 = arith.addf %114, %116 : vector<2x8x32xf32>
    %118 = vector.shape_cast %117 : vector<2x8x32xf32> to vector<16x32xf32>
    %119 = vector.shape_cast %118 : vector<16x32xf32> to vector<2x8x32xf32>
    %c0_41 = arith.constant 0 : index
    %c0_42 = arith.constant 0 : index
    %c0_43 = arith.constant 0 : index
    %120 = vector.load %arg7[%c0_41, %c0_42, %c0_43] : memref<2x8x32xf32, #tpu.memory_space<vmem>>, vector<2x8x32xf32>
    tpu.vector_store %arg7[%c0_41, %c0_42, %c0_43], %119 {strides = array<i32>} : memref<2x8x32xf32, #tpu.memory_space<vmem>>, vector<2x8x32xf32>,
    return
  }
  func.func @transform_0(%arg0: i32) -> (i32, i32, i32) {
    %c0_i32 = arith.constant 0 : i32
    %c0_i32_0 = arith.constant 0 : i32
    %c0_i32_1 = arith.constant 0 : i32
    return %arg0, %c0_i32, %c0_i32_0 : i32, i32, i32
  }
  func.func @transform_1(%arg0: i32) -> (i32, i32) {
    %c0_i32 = arith.constant 0 : i32
    %c0_i32_0 = arith.constant 0 : i32
    %c0_i32_1 = arith.constant 0 : i32
    return %c0_i32, %c0_i32_0 : i32, i32
  }
  func.func @transform_2(%arg0: i32) -> (i32, i32, i32) {
    %c0_i32 = arith.constant 0 : i32
    %c0_i32_0 = arith.constant 0 : i32
    %c0_i32_1 = arith.constant 0 : i32
    %c0_i32_2 = arith.constant 0 : i32
    return %c0_i32, %c0_i32_0, %c0_i32_1 : i32, i32, i32
  }
  func.func @transform_3(%arg0: i32) -> (i32, i32) {
    %c0_i32 = arith.constant 0 : i32
    %c0_i32_0 = arith.constant 0 : i32
    %c0_i32_1 = arith.constant 0 : i32
    return %c0_i32, %c0_i32_0 : i32, i32
  }
  func.func @transform_4(%arg0: i32) -> (i32, i32) {
    %c0_i32 = arith.constant 0 : i32
    %c0_i32_0 = arith.constant 0 : i32
    %c0_i32_1 = arith.constant 0 : i32
    return %c0_i32, %c0_i32_0 : i32, i32
  }
  func.func @transform_5(%arg0: i32) -> (i32, i32) {
    %c0_i32 = arith.constant 0 : i32
    %c0_i32_0 = arith.constant 0 : i32
    %c0_i32_1 = arith.constant 0 : i32
    return %c0_i32, %c0_i32_0 : i32, i32
  }
  func.func @transform_6(%arg0: i32) -> (i32, i32, i32) {
    %c0_i32 = arith.constant 0 : i32
    %c0_i32_0 = arith.constant 0 : i32
    %c0_i32_1 = arith.constant 0 : i32
    return %arg0, %c0_i32, %c0_i32_0 : i32, i32, i32
  }
}

</mosaic_0001>

<bundles_post_ra>
// kernel: tpu_custom_call.1
= control target key start
LH: loop header
LB: loop body
LE: loop exit
PB: predicated region body
PF: predicated region fallthrough
CT: control target
= control target key end

     0   :  { %11 = vsyncpa [#allocation3], 0  ;;  %s2438_s0 = inlined_call_operand.vmem [shape: f32[4,8,32], index: 0, kind: input, shape index: {}]   ;;  %s2439_s1 = inlined_call_operand.vmem [shape: f32[96,32], index: 1, kind: input, shape index: {}]   ;;  %s2440_s2 = inlined_call_operand.vmem [shape: f32[4,8,32], index: 2, kind: input, shape index: {}]   ;;  %s2441_s3 = inlined_call_operand.vmem [shape: f32[32,64], index: 3, kind: input, shape index: {}]   ;;  %s2442_s4 = inlined_call_operand.vmem [shape: f32[64,32], index: 4, kind: input, shape index: {}]   ;;  %s2443_s5 = inlined_call_operand.vmem [shape: f32[8,64], index: 5, kind: input, shape index: {}]   ;;  %s2444_s6 = inlined_call_operand.hbm [shape: f32[4,8,32], index: 6, kind: output, shape index: {}]  }
   0x1   :  { %13 = vsyncpa [#allocation3 + $0x1], 0  ;;  %s2016_s21 = smov 0   ;;  %s2018_s22 = smov 0  }
   0x2   :  { %s2020_s23 = smov 0   ;;  %s2022_s24 = smov 0  }
   0x3 LB: > { %s2037_s25 = sadd.s32 4294967295, %s1975_s24   ;;  %s1752_s26 = sadd.s32 4294967294, %s1975_s24   ;;  %s1975_s24 = sphi %s2022_s24, %s2450_s24   ;;  %s1971_s23 = sphi %s2020_s23, %s2449_s23   ;;  %s1967_s22 = sphi %s2018_s22, %s2448_s22   ;;  %s1963_s21 = sphi %s2016_s21, %s2447_s21  }
   0x4   : > { %s2041_s27 = sadd.s32 1, %s1975_s24   ;;  %s157_s28 = sadd.s32 1, %s1971_s23 }
   0x5   : > { %s154_s29 = ssub.s32 %s1975_s24, %s2041_s27  ;;  %p167_p0 = scmp.ne.s32.totalorder %s1971_s23, %s1967_s22 }
   0x6   : > { %p155_p1 = scmp.eq.s32.totalorder %s154_s29, 0  ;;  %p168_p2 = scmp.eq.s32.totalorder %s2037_s25, 1 }
   0x7   : > { %p173_p3 = scmp.ne.s32.totalorder %s1967_s22, %s1963_s21  ;;  %p174_p4 = scmp.eq.s32.totalorder %s1752_s26, 1 }
   0x8   : > { %s2052_s30 = scalar_select %p155_p1, %s1971_s23, %s157_s28  }
   0x9   : > { %p2054_p5 = por %p168_p2, %p167_p0  ;;  %p2058_p6 = por %p174_p4, %p173_p3 }
   0xa   : > { %p1755_p7 = scmp.ge.s32.totalorder %s1975_s24, 1  ;;  %p216_p8 = scmp.lt.s32.totalorder %s1975_s24, 3 }
   0xc   : > { %p217_p9 = pnand %p1755_p7, %p216_p8 }
   0xd   : > { %s1757_s9 = sshll.u32 (!%p217_p9), %s2037_s25, 1  ;;  %s1977_s29 = smov (!%p217_p9), 120  }
   0xe   : > { %220 = sbr.rel (%p217_p9) target bundleno = 1954 (0x7a2), region = 44  ;;  %p247_p10 = scmp.lt.s32.totalorder (!%p217_p9), %s1757_s9, 3 }
   0xf   : > { %s1814_s16 = sshll.u32 (!%p217_p9), %s2037_s25, 4  ;;  %s1933_s11 = scalar_lea.hbm (!%p217_p9), %s2444_s6, 32 }
  0x10   : > { %s1686_s19 = scalar_lea.hbm (!%p217_p9), %s2444_s6, %s1814_s16 }
  0x11   : > { %s1689_s26 = sshll.u32 (!%p217_p9), %s1686_s19, 4  ;;  %s1690_s26 = int_to_ptr.hbm [resolvable:$true] %s1689_s26 }
  0x12   : > { %s1927_s28 = sshra.s32 (!%p217_p9), %s1690_s26, 4  ;;  %s1928_s28 = int_to_ptr.hbm [resolvable:$true] %s1927_s28 }
  0x13   : > { %s2452_s9 = smov (!%p247_p10, %s1757_s9), 3  ;;  %vm267_vm0 = vcmask 261120   ;;  %v255_v2 = vld [vmem:[%s2439_s1] sm:$0xff]  ;;  %v256_v3 = vld [vmem:[%s2439_s1 + $0x8] sm:$0xff]  ;;  %v257_v4 = vld [vmem:[%s2439_s1 + $0x10] sm:$0xff]  ;;  %vm396_vm1 = vcmask 64512   ;;  %p1934_p0 = scmp.lt.s32.totalorder %s1928_s28, %s2444_s6 }
  0x14   : > { %s1758_s10 = sshll.u32 %s2452_s9, 3  ;;  %v258_v5 = vld [vmem:[%s2439_s1 + $0x18] sm:$0xff]  ;;  %v259_v6 = vld [vmem:[%s2439_s1 + $0x20] sm:$0xff]  ;;  %v260_v7 = vld [vmem:[%s2439_s1 + $0x28] sm:$0xff] }
  0x15   : > { %s250_s13 = scalar_lea.vmem %s2438_s0, %s1758_s10  ;;  %v261_v9 = vld [vmem:[%s2439_s1 + $0x30] sm:$0xff]  ;;  %v262_v11 = vld [vmem:[%s2439_s1 + $0x38] sm:$0xff]  ;;  %v263_v21 = vld [vmem:[%s2439_s1 + $0x40] sm:$0xff] }
  0x16   : > { %v2068_v0 = vld [vmem:[%s250_s13 + $0x8] sm:$0xff]  ;;  %v2074_v1 = vld [vmem:[%s250_s13] sm:$0xff]  ;;  %v265_v14 = vld [vmem:[%s2439_s1 + $0x50] sm:$0xff]  ;;  %s243_s13 = sand.u32 1, %s1967_s22  }
  0x17   : > { %1759 = vmatpush.xpose.msk.msra.mxu0 %vm267_vm0, %v2068_v0  ;;  %1815 = vmatpush.xpose.msk.msra.mxu3 %vm267_vm0, %v2068_v0  ;;  %v266_v18 = vld [vmem:[%s2439_s1 + $0x58] sm:$0xff]  ;;  %v264_v37 = vld [vmem:[%s2439_s1 + $0x48] sm:$0xff]  ;;  %s1756_s14 = sshll.u32 %s243_s13, 4  ;;  %s1675_s25 = scalar_lea.sflag [#allocation3], %s243_s13 }
  0x18   : > { %s2394_s15 = scalar_lea.vmem [#allocation2], %s1756_s14 }
  0x19   : > { %s1687_s20 = sshll.u32 %s2394_s15, 4  ;;  %s1688_s20 = int_to_ptr.vmem [resolvable:$true] %s1687_s20 }
  0x1b   : > { %1760 = vmatpush.xpose.msk.msra.mxu0 %vm267_vm0, %v2074_v1  ;;  %1816 = vmatpush.xpose.msk.msra.mxu3 %vm267_vm0, %v2074_v1 }
  0x1e   : > { %1761 = vmatmul.msk.f32.vlgmr.msra.gmra.mxu0 %vm267_vm0, %v255_v2  ;;  %1771 = vmatmul.msk.f32.vlgmr.msra.gmra.mxu3 %vm267_vm0, %v265_v14 }
  0x26   : > { %1762 = vmatmul.msk.f32.gmra.mxu0 %vm267_vm0, %v256_v3  ;;  %1772 = vmatmul.msk.f32.gmra.mxu3 %vm267_vm0, %v266_v18 }
  0x2e   : > { %1763 = vmatmul.msk.f32.gmra.mxu0 %vm267_vm0, %v257_v4 }
  0x36   : > { %1764 = vmatmul.msk.f32.gmra.mxu0 %vm267_vm0, %v258_v5 }
  0x3e   : > { %1765 = vmatmul.msk.f32.gmra.mxu0 %vm267_vm0, %v259_v6 }
  0x46   : > { %1766 = vmatmul.msk.f32.gmra.mxu0 %vm267_vm0, %v260_v7 }
  0x4e   : > { %1767 = vmatmul.msk.f32.gmra.mxu0 %vm267_vm0, %v261_v9 }
  0x56   : > { %1768 = vmatmul.msk.f32.gmra.mxu0 %vm267_vm0, %v262_v11 }
  0x5e   : > { %1769 = vmatmul.msk.f32.gmra.mxu0 %vm267_vm0, %v263_v21 }
  0x66   : > { %1770 = vmatmul.msk.f32.gmra.mxu0 %vm267_vm0, %v264_v37 }
  0x9b   : > { %v2103_v8 = vpop.f32.mrf.mxu0 }
  0xa1   : > { %v2154_v26 = vpop.f32.mrf.mxu3 }
  0xa3   : > { %v2109_v10 = vpop.f32.mrf.mxu0 }
  0xa4   : > { %420 = vxpose.xlu0.b32.start.end [1/1] (short) (narrow) %v2109_v10, 8 }
  0xa9   : > { %v2160_v28 = vpop.f32.mrf.mxu3 }
  0xab   : > { %v2116_v12 = vpop.f32.mrf.mxu0 }
  0xac   : > { %364 = vxpose.xlu0.b32.start.end [1/1] (short) (narrow) %v2103_v8, 8  ;;  %475 = vxpose.xlu1.b32.start.end [1/1] (short) (narrow) %v2116_v12, 8 }
  0xb3   : > { %v2121_v13 = vpop.f32.mrf.mxu0 }
  0xb4   : > { %530 = vxpose.xlu1.b32.start.end [1/1] (short) (narrow) %v2121_v13, 8 }
  0xbb   : > { %v2128_v15 = vpop.f32.mrf.mxu0 }
  0xbc   : > { %415 = vmatpush.msra.mxu1 %v2128_v15 }
  0xc3   : > { %v2131_v16 = vpop.f32.mrf.mxu0 }
  0xc4   : > { %v1861_v17 = vpack.i.bf16 %v2131_v16, %v2128_v15  ;;  %470 = vmatpush.msra.mxu2 %v2131_v16 }
  0xcb   : > { %v2140_v19 = vpop.f32.mrf.mxu0 }
  0xcc   : > { %525 = vmatpush.msrb.mxu3 %v2140_v19 }
  0xd3   : > { %v2143_v20 = vpop.f32.mrf.mxu0 }
  0xd4   : > { %580 = vmatpush.msrb.mxu1 %v2143_v20  ;;  %v1866_v58 = vpack.i.bf16 %v2143_v20, %v2140_v19 }
  0xdb   : > { %v2158_v27 = vpop.f32.mrf.mxu0 }
  0xdc   : > { %1777 = vmatpush.xpose.msk.msrb.mxu2 %vm396_vm1, %v2158_v27 }
  0xe3   : > { %v2202_v59 = vpop.f32.mrf.mxu0 }
  0xe4   : > { %1779 = vmatpush.xpose.msk.msra.mxu3 %vm396_vm1, %v2202_v59 }
 0x148   : > { %v436_v22 = vpop.trf.xlu0 }
 0x149   : > { %1774 = vmatmul.msk.f32.vlgmr.msra.gmra.mxu2 %vm396_vm1, %v436_v22 }
 0x14a   : > { %1783 = vmatpush.xpose.msk.msra.mxu2 %vm396_vm1, %v2160_v28 }
 0x150   : > { %v380_v23 = vpop.trf.xlu0  ;;  %v491_v24 = vpop.trf.xlu1 }
 0x151   : > { %1773 = vmatmul.msk.f32.vlgmr.msra.gmra.mxu1 %vm396_vm1, %v380_v23  ;;  %1775 = vmatmul.msk.f32.vlgmr.msrb.gmra.mxu3 %vm396_vm1, %v491_v24 }
 0x152   : > { %1781 = vmatpush.xpose.msk.msra.mxu1 %vm396_vm1, %v2154_v26 }
 0x158   : > { %v546_v25 = vpop.trf.xlu1 }
 0x159   : > { %1776 = vmatmul.msk.f32.vlgmr.msrb.gmra.mxu1 %vm396_vm1, %v546_v25 }
 0x1cc   : > { %v472_v31 = vpop.f32.mrf.mxu2 }
 0x1cd   : > { %v588_v35 = vsel %vm396_vm1, %v472_v31, -inf }
 0x1ce   : > { %v417_v29 = vpop.f32.mrf.mxu1 }
 0x1cf   : > { %v585_v30 = vsel %vm396_vm1, %v417_v29, -inf }
 0x1d0   : > { %586 = vmax.xlane.f32.xlu2 %v585_v30 }
 0x1d4   : > { %v527_v32 = vpop.f32.mrf.mxu3 }
 0x1d5   : > { %v591_v33 = vsel %vm396_vm1, %v527_v32, -inf }
 0x1d6   : > { %592 = vmax.xlane.f32.xlu1 %v591_v33  ;;  %v582_v34 = vpop.f32.mrf.mxu1 }
 0x1d7   : > { %v594_v36 = vsel %vm396_vm1, %v582_v34, -inf }
 0x1d8   : > { %589 = vmax.xlane.f32.xlu2 %v588_v35  ;;  %595 = vmax.xlane.f32.xlu0 %v594_v36 }
 0x243   : > { %v587_v38 = vpop.xlane.xlu2 %586 }
 0x244   : > { %v597_v39 = vsub.f32 %v417_v29, %v587_v38 }
 0x246   : > { %v601_v40 = vmul.f32 1.442695, %v597_v39 }
 0x248   : > { %1871 = vpow2.f32 %v601_v40  ;;  %v2212_v40 = vld [vmem:[%s2440_s2 + $0x8] sm:$0xff] }
 0x249   : > { %v593_v49 = vpop.xlane.xlu1 %592  ;;  %830 = vmatpush.msrb.mxu1 %v2212_v40 }
 0x24a   : > { %v599_v51 = vsub.f32 %v527_v32, %v593_v49 }
 0x24b   : > { %v590_v41 = vpop.xlane.xlu2 %589  ;;  %v596_v42 = vpop.xlane.xlu0 %595 }
 0x24c   : > { %v598_v43 = vsub.f32 %v472_v31, %v590_v41  ;;  %v600_v46 = vsub.f32 %v582_v34, %v596_v42  ;;  %v605_v53 = vmul.f32 1.442695, %v599_v51  ;;  %v2217_v41 = vld [vmem:[%s2440_s2 + $0x10] sm:$0xff] }
 0x24e   : > { %v1872_v44 = vpop.eup %1871  ;;  %v603_v45 = vmul.f32 1.442695, %v598_v43  ;;  %v607_v48 = vmul.f32 1.442695, %v600_v46 }
 0x24f   : > { %v609_v47 = vsel %vm396_vm1, %v1872_v44, 0.0 }
 0x250   : > { %1873 = vpow2.f32 %v603_v45  ;;  %610 = vadd.xlane.f32.xlu2 %v609_v47 }
 0x251   : > { %1875 = vpow2.f32 %v607_v48 }
 0x252   : > { %1877 = vpow2.f32 %v605_v53 }
 0x256   : > { %v2175_v50 = vpop.eup %1873 }
 0x257   : > { %v612_v52 = vsel %vm396_vm1, %v2175_v50, 0.0  ;;  %v2179_v54 = vpop.eup %1875 }
 0x258   : > { %613 = vadd.xlane.f32.xlu2 %v612_v52  ;;  %v618_v55 = vsel %vm396_vm1, %v2179_v54, 0.0  ;;  %v2183_v56 = vpop.eup %1877  ;;  %v2226_v52 = vld [vmem:[%s2440_s2] sm:$0xff] }
 0x259   : > { %v615_v57 = vsel %vm396_vm1, %v2183_v56, 0.0  ;;  %807 = vmatpush.msrb.mxu3 %v2226_v52 }
 0x260   : > { %619 = vadd.xlane.f32.xlu2 %v618_v55 }
 0x268   : > { %616 = vadd.xlane.f32.xlu2 %v615_v57 }
 0x280   : > { %889 = vrot.lane.b32.xlu2 %v2103_v8, %s1977_s29 }
 0x288   : > { %952 = vrot.lane.b32.xlu2 %v2109_v10, %s1977_s29 }
 0x290   : > { %1015 = vrot.lane.b32.xlu2 %v2116_v12, %s1977_s29 }
 0x298   : > { %1078 = vrot.lane.b32.xlu2 %v2121_v13, %s1977_s29 }
 0x2a0   : > { %1862 = vrot.lane.b32.xlu2 %v1861_v17, %s1977_s29 }
 0x2a8   : > { %1867 = vrot.lane.b32.xlu2 %v1866_v58, %s1977_s29 }
 0x2c3   : > { %v611_v60 = vpop.xlane.xlu2 %610 }
 0x2c4   : > { %1879 = vrcp.f32 %v611_v60  ;;  %v632_v4 = vand.u32 2147483648, %v611_v60  ;;  %v630_v5 = vand.u32 2147483647, %v611_v60  ;;  %vm626_vm3 = vweird.f32 %v611_v60 }
 0x2c6   : > { %v633_v8 = vor.u32 1.1754944e-38, %v632_v4  ;;  %vm631_vm5 = vcmp.eq.f32.partialorder %v630_v5, 8.507059e+37 }
 0x2ca   : > { %v1880_v61 = vpop.eup %1879 }
 0x2cb   : > { %v622_v62 = vmul.f32 %v1880_v61, %v611_v60  ;;  %v614_v63 = vpop.xlane.xlu2 %613  ;;  %vm627_vm2 = vweird.f32 %v1880_v61 }
 0x2cc   : > { %1881 = vrcp.f32 %v614_v63  ;;  %vm628_vm4 = vmor %vm626_vm3, %vm627_vm2  ;;  %v646_v14 = vand.u32 2147483648, %v614_v63  ;;  %v644_v17 = vand.u32 2147483647, %v614_v63  ;;  %vm640_vm7 = vweird.f32 %v614_v63 }
 0x2cd   : > { %v623_v2 = vsub.f32 1.0, %v622_v62 }
 0x2ce   : > { %v647_v20 = vor.u32 1.1754944e-38, %v646_v14  ;;  %vm645_vm9 = vcmp.eq.f32.partialorder %v644_v17, 8.507059e+37 }
 0x2cf   : > { %v624_v3 = vmul.f32 %v1880_v61, %v623_v2 }
 0x2d1   : > { %v625_v6 = vadd.f32 %v1880_v61, %v624_v3 }
 0x2d2   : > { %v1882_v7 = vpop.eup %1881 }
 0x2d3   : > { %v636_v9 = vmul.f32 %v1882_v7, %v614_v63  ;;  %v620_v10 = vpop.xlane.xlu2 %619  ;;  %v629_v11 = vsel %vm628_vm4, %v1880_v61, %v625_v6  ;;  %vm641_vm6 = vweird.f32 %v1882_v7  ;;  %v2234_v61 = vld [vmem:[%s2440_s2 + $0x18] sm:$0xff] }
 0x2d4   : > { %1883 = vrcp.f32 %v620_v10  ;;  %v634_v13 = vsel %vm631_vm5, %v633_v8, %v629_v11  ;;  %vm642_vm8 = vmor %vm640_vm7, %vm641_vm6  ;;  %v674_v30 = vand.u32 2147483648, %v620_v10  ;;  %v672_v32 = vand.u32 2147483647, %v620_v10 }
 0x2d5   : > { %v637_v12 = vsub.f32 1.0, %v636_v9  ;;  %v677_v15 = vmul.f32 %v1872_v44, %v634_v13  ;;  %vm668_vm11 = vweird.f32 %v620_v10 }
 0x2d6   : > { %v675_v35 = vor.u32 1.1754944e-38, %v674_v30  ;;  %vm673_vm13 = vcmp.eq.f32.partialorder %v672_v32, 8.507059e+37 }
 0x2d7   : > { %v638_v16 = vmul.f32 %v1882_v7, %v637_v12  ;;  %1778 = vmatmul.msk.f32.vlgmr.msrb.gmra.mxu2 %vm396_vm1, %v677_v15 }
 0x2d8   : > { %853 = vmatpush.msrb.mxu2 %v2217_v41 }
 0x2d9   : > { %v639_v18 = vadd.f32 %v1882_v7, %v638_v16 }
 0x2da   : > { %v1884_v19 = vpop.eup %1883 }
 0x2db   : > { %v643_v21 = vsel %vm642_vm8, %v1882_v7, %v639_v18  ;;  %v664_v22 = vmul.f32 %v1884_v19, %v620_v10  ;;  %v617_v23 = vpop.xlane.xlu2 %616  ;;  %vm669_vm10 = vweird.f32 %v1884_v19 }
 0x2dc   : > { %v648_v24 = vsel %vm645_vm9, %v647_v20, %v643_v21  ;;  %1885 = vrcp.f32 %v617_v23  ;;  %vm670_vm12 = vmor %vm668_vm11, %vm669_vm10  ;;  %v660_v44 = vand.u32 2147483648, %v617_v23  ;;  %v658_v46 = vand.u32 2147483647, %v617_v23 }
 0x2dd   : > { %v665_v25 = vsub.f32 1.0, %v664_v22  ;;  %v678_v29 = vmul.f32 %v2175_v50, %v648_v24  ;;  %vm654_vm15 = vweird.f32 %v617_v23 }
 0x2de   : > { %v661_v48 = vor.u32 1.1754944e-38, %v660_v44  ;;  %vm659_vm3 = vcmp.eq.f32.partialorder %v658_v46, 8.507059e+37 }
 0x2df   : > { %v666_v31 = vmul.f32 %v1884_v19, %v665_v25  ;;  %1780 = vmatmul.msk.f32.vlgmr.msra.gmra.mxu3 %vm396_vm1, %v678_v29 }
 0x2e0   : > { %876 = vmatpush.msra.mxu3 %v2234_v61 }
 0x2e1   : > { %v667_v33 = vadd.f32 %v1884_v19, %v666_v31 }
 0x2e2   : > { %v1886_v34 = vpop.eup %1885 }
 0x2e3   : > { %v671_v36 = vsel %vm670_vm12, %v1884_v19, %v667_v33  ;;  %v650_v37 = vmul.f32 %v1886_v34, %v617_v23  ;;  %v890_v38 = vpop.permute.xlu2 %889  ;;  %vm655_vm14 = vweird.f32 %v1886_v34 }
 0x2e4   : > { %v676_v39 = vsel %vm673_vm13, %v675_v35, %v671_v36  ;;  %892 = vxpose.xlu1.b32.start.end [1/1] (short) (narrow) %v890_v38, 8  ;;  %vm656_vm2 = vmor %vm654_vm15, %vm655_vm14 }
 0x2e5   : > { %v651_v42 = vsub.f32 1.0, %v650_v37  ;;  %v680_v43 = vmul.f32 %v2179_v54, %v676_v39 }
 0x2e7   : > { %v652_v45 = vmul.f32 %v1886_v34, %v651_v42  ;;  %1784 = vmatmul.msk.f32.vlgmr.msra.gmra.mxu2 %vm396_vm1, %v680_v43 }
 0x2e9   : > { %v653_v47 = vadd.f32 %v1886_v34, %v652_v45 }
 0x2eb   : > { %v657_v49 = vsel %vm656_vm2, %v1886_v34, %v653_v47  ;;  %v953_v50 = vpop.permute.xlu2 %952 }
 0x2ec   : > { %v662_v51 = vsel %vm659_vm3, %v661_v48, %v657_v49  ;;  %955 = vxpose.xlu2.b32.start.end [1/1] (short) (narrow) %v953_v50, 8 }
 0x2ed   : > { %v679_v53 = vmul.f32 %v2183_v56, %v662_v51 }
 0x2ef   : > { %1782 = vmatmul.msk.f32.vlgmr.msra.gmra.mxu1 %vm396_vm1, %v679_v53 }
 0x2f3   : > { %v1016_v54 = vpop.permute.xlu2 %1015 }
 0x2f4   : > { %1018 = vxpose.xlu0.b32.start.end [1/1] (short) (narrow) %v1016_v54, 8 }
 0x2fb   : > { %v1079_v55 = vpop.permute.xlu2 %1078 }
 0x2fc   : > { %1081 = vxpose.xlu2.b32.start.end [1/1] (short) (narrow) %v1079_v55, 8 }
 0x303   : > { %v1863_v57 = vpop.permute.xlu2 %1862 }
 0x304   : > { %v1865_v58 = vunpack.i.h.bf16 %v1863_v57  ;;  %v1864_v60 = vunpack.i.l.bf16 %v1863_v57 }
 0x306   : > { %946 = vmatpush.msra.mxu1 %v1864_v60  ;;  %1009 = vmatpush.msra.mxu2 %v1865_v58 }
 0x30b   : > { %v1868_v56 = vpop.permute.xlu2 %1867 }
 0x30c   : > { %v1869_v62 = vunpack.i.l.bf16 %v1868_v56  ;;  %v1870_v2 = vunpack.i.h.bf16 %v1868_v56 }
 0x35a   : > { %v704_v63 = vpop.f32.mrf.mxu2 }
 0x35b   : > { %1785 = vmatmul.msk.f32.vlgmr.msrb.gmra.mxu3 %vm396_vm1, %v704_v63 }
 0x35c   : > { %1072 = vmatpush.msrb.mxu3 %v1869_v62 }
 0x362   : > { %v730_v3 = vpop.f32.mrf.mxu3 }
 0x363   : > { %1786 = vmatmul.msk.f32.vlgmr.msrb.gmra.mxu1 %vm396_vm1, %v730_v3 }
 0x364   : > { %1135 = vmatpush.msrb.mxu1 %v1870_v2 }
 0x36a   : > { %v782_v4 = vpop.f32.mrf.mxu2 }
 0x36b   : > { %1788 = vmatmul.msk.f32.vlgmr.msra.gmra.mxu3 %vm396_vm1, %v782_v4 }
 0x36c   : > { %v756_v5 = vpop.f32.mrf.mxu1 }
 0x36d   : > { %1787 = vmatmul.msk.f32.vlgmr.msrb.gmra.mxu2 %vm396_vm1, %v756_v5 }
 0x385   : > { %v971_v6 = vpop.trf.xlu2 }
 0x386   : > { %1790 = vmatmul.msk.f32.vlgmr.msra.gmra.mxu2 %vm396_vm1, %v971_v6 }
 0x388   : > { %v908_v7 = vpop.trf.xlu1 }
 0x389   : > { %1789 = vmatmul.msk.f32.vlgmr.msra.gmra.mxu1 %vm396_vm1, %v908_v7 }
 0x395   : > { %v1097_v8 = vpop.trf.xlu2 }
 0x396   : > { %1792 = vmatmul.msk.f32.vlgmr.msrb.gmra.mxu1 %vm396_vm1, %v1097_v8 }
 0x398   : > { %v1034_v9 = vpop.trf.xlu0 }
 0x399   : > { %1791 = vmatmul.msk.f32.vlgmr.msrb.gmra.mxu3 %vm396_vm1, %v1034_v9 }
 0x3de   : > { %v809_v10 = vpop.f32.mrf.mxu3 }
 0x3df   : > { %v881_v12 = vsel %vm267_vm0, %v809_v10, 0.0 }
 0x3e0   : > { %v832_v11 = vpop.f32.mrf.mxu1 }
 0x3e1   : > { %v882_v13 = vsel %vm267_vm0, %v832_v11, 0.0 }
 0x3e2   : > { %v883_v14 = vadd.f32 %v882_v13, %v881_v12 }
 0x3ee   : > { %v878_v15 = vpop.f32.mrf.mxu3 }
 0x3ef   : > { %v886_v19 = vsel %vm267_vm0, %v878_v15, 0.0 }
 0x3f0   : > { %v855_v16 = vpop.f32.mrf.mxu2 }
 0x3f1   : > { %v884_v17 = vsel %vm267_vm0, %v855_v16, 0.0 }
 0x3f2   : > { %v885_v18 = vadd.f32 %v884_v17, %v883_v14 }
 0x3f4   : > { %v2249_v20 = vadd.f32 %v886_v19, %v885_v18 }
 0x406   : > { %v948_v21 = vpop.f32.mrf.mxu1 }
 0x407   : > { %v1140_v22 = vsel %vm396_vm1, %v948_v21, -inf }
 0x408   : > { %1141 = vmax.xlane.f32.xlu2 %v1140_v22 }
 0x409   : > { %v1011_v23 = vpop.f32.mrf.mxu2 }
 0x40a   : > { %v1143_v24 = vsel %vm396_vm1, %v1011_v23, -inf }
 0x40b   : > { %1144 = vmax.xlane.f32.xlu1 %v1143_v24 }
 0x413   : > { %v1137_v25 = vpop.f32.mrf.mxu1 }
 0x414   : > { %v1149_v29 = vsel %vm396_vm1, %v1137_v25, -inf }
 0x415   : > { %1150 = vmax.xlane.f32.xlu0 %v1149_v29 }
 0x41c   : > { %v1074_v30 = vpop.f32.mrf.mxu3 }
 0x41d   : > { %v1146_v31 = vsel %vm396_vm1, %v1074_v30, -inf }
 0x41e   : > { %1147 = vmax.xlane.f32.xlu1 %v1146_v31 }
 0x429   : > { %1236 = vrot.lane.b32.xlu0 %v2158_v27, %s1977_s29 }
 0x431   : > { %1290 = vrot.lane.b32.xlu0 %v2154_v26, %s1977_s29 }
 0x47b   : > { %v1142_v32 = vpop.xlane.xlu2 %1141 }
 0x47c   : > { %v1152_v33 = vsub.f32 %v948_v21, %v1142_v32 }
 0x47e   : > { %v1156_v34 = vmul.f32 1.442695, %v1152_v33  ;;  %v1145_v35 = vpop.xlane.xlu1 %1144 }
 0x47f   : > { %v1153_v36 = vsub.f32 %v1011_v23, %v1145_v35 }
 0x480   : > { %1887 = vpow2.f32 %v1156_v34 }
 0x481   : > { %v1158_v37 = vmul.f32 1.442695, %v1153_v36 }
 0x483   : > { %1889 = vpow2.f32 %v1158_v37 }
 0x486   : > { %v1888_v38 = vpop.eup %1887 }
 0x487   : > { %v1164_v39 = vsel %vm396_vm1, %v1888_v38, 0.0 }
 0x488   : > { %1165 = vadd.xlane.f32.xlu2 %v1164_v39  ;;  %v1151_v42 = vpop.xlane.xlu0 %1150 }
 0x489   : > { %v1155_v43 = vsub.f32 %v1137_v25, %v1151_v42  ;;  %v2260_v45 = vpop.eup %1889 }
 0x48a   : > { %v1167_v26 = vsel %vm396_vm1, %v2260_v45, 0.0 }
 0x48b   : > { %v1162_v44 = vmul.f32 1.442695, %v1155_v43 }
 0x48d   : > { %1891 = vpow2.f32 %v1162_v44 }
 0x490   : > { %1168 = vadd.xlane.f32.xlu2 %v1167_v26 }
 0x491   : > { %v1148_v27 = vpop.xlane.xlu1 %1147 }
 0x492   : > { %v1154_v46 = vsub.f32 %v1074_v30, %v1148_v27 }
 0x493   : > { %v1892_v47 = vpop.eup %1891 }
 0x494   : > { %v1160_v48 = vmul.f32 1.442695, %v1154_v46  ;;  %v1173_v49 = vsel %vm396_vm1, %v1892_v47, 0.0  ;;  %v2297_v46 = vld [vmem:[%s2443_s5] sm:$0xff] }
 0x495   : > { %1174 = vadd.xlane.f32.xlu1 %v1173_v49 }
 0x496   : > { %1893 = vpow2.f32 %v1160_v48 }
 0x49b   : > { %v1237_v50 = vpop.permute.xlu0 %1236 }
 0x49c   : > { %v2265_v51 = vpop.eup %1893  ;;  %1793 = vmatpush.xpose.msk.msrb.mxu2 %vm396_vm1, %v1237_v50 }
 0x49d   : > { %v1170_v53 = vsel %vm396_vm1, %v2265_v51, 0.0 }
 0x49e   : > { %1171 = vadd.xlane.f32.xlu1 %v1170_v53 }
 0x4a3   : > { %v1291_v54 = vpop.permute.xlu0 %1290 }
 0x4a4   : > { %1797 = vmatpush.xpose.msk.msra.mxu1 %vm396_vm1, %v1291_v54 }
 0x4a8   : > { %1385 = vmatpush.msrb.mxu1 %v2212_v40  ;;  %1317 = vrot.lane.b32.xlu2 %v2160_v28, %s1977_s29 }
 0x4b7   : > { %1263 = vrot.lane.b32.xlu1 %v2202_v59, %s1977_s29  ;;  %s1929_s29 = scalar_lea.hbm %s1928_s28, 16 }
 0x4b8   : > { %p1930_p11 = scmp.ne.s32.totalorder %s1928_s28, %s1929_s29  ;;  %p1935_p1 = scmp.lt.s32.totalorder %s1933_s11, %s1929_s29 }
 0x4ba   : > { %p1931_p12 = pnand %p1930_p11, %p2054_p5  ;;  %p1936_p2 = por %p1935_p1, %p1934_p0 }
 0x4bc   : > { %p1932_p13 = pneg %p1931_p12 }
 0x4be   : > { %p1937_p3 = pnand %p1936_p2, %p1932_p13 }
 0x4fb   : > { %v1166_v55 = vpop.xlane.xlu2 %1165 }
 0x4fc   : > { %1895 = vrcp.f32 %v1166_v55  ;;  %v1187_v62 = vand.u32 2147483648, %v1166_v55  ;;  %v1185_v2 = vand.u32 2147483647, %v1166_v55  ;;  %vm1181_vm5 = vweird.f32 %v1166_v55 }
 0x4fe   : > { %v1188_v28 = vor.u32 1.1754944e-38, %v1187_v62  ;;  %vm1186_vm7 = vcmp.eq.f32.partialorder %v1185_v2, 8.507059e+37 }
 0x502   : > { %v1896_v57 = vpop.eup %1895 }
 0x503   : > { %v1177_v58 = vmul.f32 %v1896_v57, %v1166_v55  ;;  %v2276_v60 = vpop.xlane.xlu2 %1168  ;;  %vm1182_vm4 = vweird.f32 %v1896_v57 }
 0x504   : > { %vm1183_vm6 = vmor %vm1181_vm5, %vm1182_vm4  ;;  %v1201_v36 = vand.u32 2147483648, %v2276_v60  ;;  %vm1195_vm3 = vweird.f32 %v2276_v60 }
 0x505   : > { %v1178_v56 = vsub.f32 1.0, %v1177_v58 }
 0x506   : > { %v1202_v43 = vor.u32 1.1754944e-38, %v1201_v36  ;;  %v1566_v36 = vld [vmem:[%s2442_s4 + $0x28] sm:$0xff] }
 0x507   : > { %v1179_v63 = vmul.f32 %v1896_v57, %v1178_v56 }
 0x508   : > { %v1175_v3 = vpop.xlane.xlu1 %1174 }
 0x509   : > { %v1180_v4 = vadd.f32 %v1896_v57, %v1179_v63  ;;  %1897 = vrcp.f32 %v1175_v3  ;;  %v1229_v12 = vand.u32 2147483648, %v1175_v3  ;;  %v1227_v14 = vand.u32 2147483647, %v1175_v3 }
 0x50a   : > { %1899 = vrcp.f32 %v2276_v60  ;;  %vm1223_vm9 = vweird.f32 %v1175_v3 }
 0x50b   : > { %v1184_v40 = vsel %vm1183_vm6, %v1896_v57, %v1180_v4  ;;  %v1318_v59 = vpop.permute.xlu2 %1317  ;;  %v1230_v17 = vor.u32 1.1754944e-38, %v1229_v12  ;;  %vm1228_vm11 = vcmp.eq.f32.partialorder %v1227_v14, 8.507059e+37 }
 0x50c   : > { %v1189_v5 = vsel %vm1186_vm7, %v1188_v28, %v1184_v40  ;;  %1799 = vmatpush.xpose.msk.msra.mxu2 %vm396_vm1, %v1318_v59 }
 0x50d   : > { %v1232_v6 = vmul.f32 %v1888_v38, %v1189_v5  ;;  %v1199_v38 = vand.u32 2147483647, %v2276_v60 }
 0x50f   : > { %v1898_v7 = vpop.eup %1897  ;;  %1794 = vmatmul.msk.f32.vlgmr.msrb.gmra.mxu2 %vm396_vm1, %v1232_v6  ;;  %vm1200_vm5 = vcmp.eq.f32.partialorder %v1199_v38, 8.507059e+37  ;;  %v1564_v38 = vld [vmem:[%s2442_s4 + $0x18] sm:$0xff] }
 0x510   : > { %v1219_v8 = vmul.f32 %v1898_v7, %v1175_v3  ;;  %1408 = vmatpush.msrb.mxu2 %v2217_v41  ;;  %v1900_v10 = vpop.eup %1899  ;;  %vm1224_vm8 = vweird.f32 %v1898_v7 }
 0x511   : > { %v1172_v9 = vpop.xlane.xlu1 %1171  ;;  %v1191_v15 = vmul.f32 %v1900_v10, %v2276_v60  ;;  %vm1225_vm10 = vmor %vm1223_vm9, %vm1224_vm8  ;;  %vm1196_vm15 = vweird.f32 %v1900_v10 }
 0x512   : > { %v1220_v11 = vsub.f32 1.0, %v1219_v8  ;;  %1901 = vrcp.f32 %v1172_v9  ;;  %v1215_v25 = vand.u32 2147483648, %v1172_v9  ;;  %v1213_v31 = vand.u32 2147483647, %v1172_v9  ;;  %vm1197_vm4 = vmor %vm1195_vm3, %vm1196_vm15 }
 0x513   : > { %v1192_v21 = vsub.f32 1.0, %v1191_v15  ;;  %vm1209_vm13 = vweird.f32 %v1172_v9  ;;  %v1525_v15 = vld [vmem:[%s2441_s3] sm:$0xff] }
 0x514   : > { %v1221_v13 = vmul.f32 %v1898_v7, %v1220_v11  ;;  %v1216_v33 = vor.u32 1.1754944e-38, %v1215_v25  ;;  %vm1214_vm2 = vcmp.eq.f32.partialorder %v1213_v31, 8.507059e+37  ;;  %v1527_v11 = vld [vmem:[%s2441_s3 + $0x10] sm:$0xff] }
 0x515   : > { %v1193_v29 = vmul.f32 %v1900_v10, %v1192_v21 }
 0x516   : > { %v1222_v16 = vadd.f32 %v1898_v7, %v1221_v13  ;;  %v1526_v13 = vld [vmem:[%s2441_s3 + $0x8] sm:$0xff] }
 0x517   : > { %v1194_v34 = vadd.f32 %v1900_v10, %v1193_v29  ;;  %v1519_v29 = vperm.slane %v2297_v46, 1 }
 0x518   : > { %v1902_v18 = vpop.eup %1901  ;;  %v1226_v19 = vsel %vm1225_vm10, %v1898_v7, %v1222_v16 }
 0x519   : > { %v1231_v22 = vsel %vm1228_vm11, %v1230_v17, %v1226_v19  ;;  %v1205_v41 = vmul.f32 %v1902_v18, %v1172_v9  ;;  %vm1210_vm12 = vweird.f32 %v1902_v18  ;;  %v1198_v42 = vsel %vm1197_vm4, %v1900_v10, %v1194_v34  ;;  %v1528_v10 = vld [vmem:[%s2441_s3 + $0x18] sm:$0xff] }
 0x51a   : > { %v1235_v23 = vmul.f32 %v1892_v47, %v1231_v22  ;;  %vm1211_vm14 = vmor %vm1209_vm13, %vm1210_vm12  ;;  %v1203_v44 = vsel %vm1200_vm5, %v1202_v43, %v1198_v42  ;;  %v1443_v47 = vperm.slane %v2297_v46, 0  ;;  %v1568_v34 = vld [vmem:[%s2442_s4 + $0x38] sm:$0xff]  ;;  %v1562_v42 = vld [vmem:[%s2442_s4 + $0x8] sm:$0xff] }
 0x51b   : > { %v1206_v24 = vsub.f32 1.0, %v1205_v41  ;;  %v1233_v27 = vmul.f32 %v2260_v45, %v1203_v44  ;;  %v1978_v45 = vmov 8.0   ;;  %v1561_v43 = vld [vmem:[%s2442_s4] sm:$0xff] }
 0x51c   : > { %1800 = vmatmul.msk.f32.vlgmr.msra.gmra.mxu2 %vm396_vm1, %v1235_v23  ;;  %v1444_v48 = vadd.f32 %v1443_v47, %v2249_v20  ;;  %1903 = vrcp.f32 %v1978_v45 }
 0x51d   : > { %v1207_v30 = vmul.f32 %v1902_v18, %v1206_v24  ;;  %1585 = vmatpush.msra.mxu2 %v1568_v34 }
 0x51e   : > { %v1446_v49 = vadd.f32 %v1444_v48, %v2074_v1 }
 0x51f   : > { %v1208_v32 = vadd.f32 %v1902_v18, %v1207_v30 }
 0x520   : > { %v1471_v50 = vmul.f32 %v1446_v49, %v1446_v49 }
 0x521   : > { %v1212_v35 = vsel %vm1211_vm14, %v1902_v18, %v1208_v32  ;;  %v1522_v32 = vperm.slane %v2297_v46, 2 }
 0x522   : > { %v1217_v37 = vsel %vm1214_vm2, %v1216_v33, %v1212_v35  ;;  %v1904_v53 = vpop.eup %1903  ;;  %v1567_v35 = vld [vmem:[%s2442_s4 + $0x30] sm:$0xff] }
 0x523   : > { %v1234_v39 = vmul.f32 %v2265_v51, %v1217_v37  ;;  %v1463_v57 = vmul.f32 8.0, %v1904_v53  ;;  %vm1467_vm6 = vweird.f32 %v1904_v53  ;;  %1586 = vmatpush.msra.mxu2 %v1567_v35  ;;  %v1565_v37 = vld [vmem:[%s2442_s4 + $0x20] sm:$0xff] }
 0x525   : > { %1798 = vmatmul.msk.f32.vlgmr.msra.gmra.mxu1 %vm396_vm1, %v1234_v39  ;;  %v1464_v56 = vsub.f32 1.0, %v1463_v57  ;;  %1587 = vmatpush.msra.mxu2 %v1566_v36  ;;  %v1563_v39 = vld [vmem:[%s2442_s4 + $0x10] sm:$0xff] }
 0x526   : > { %1548 = vmatpush.msra.mxu1 %v1528_v10 }
 0x527   : > { %v1465_v20 = vmul.f32 %v1904_v53, %v1464_v56  ;;  %1588 = vmatpush.msra.mxu2 %v1565_v37 }
 0x528   : > { %1549 = vmatpush.msra.mxu1 %v1527_v11 }
 0x529   : > { %v1264_v26 = vpop.permute.xlu1 %1263  ;;  %v1466_v3 = vadd.f32 %v1904_v53, %v1465_v20  ;;  %1589 = vmatpush.msra.mxu2 %v1564_v38 }
 0x52a   : > { %1795 = vmatpush.xpose.msk.msra.mxu3 %vm396_vm1, %v1264_v26  ;;  %1550 = vmatpush.msra.mxu1 %v1526_v13 }
 0x52b   : > { %v2306_v40 = vsel %vm1467_vm6, %v1904_v53, %v1466_v3  ;;  %1590 = vmatpush.msra.mxu2 %v1563_v39  ;;  %v1529_v53 = vperm.slane %v2297_v46, 3 }
 0x52c   : > { %1551 = vmatpush.msra.mxu1 %v1525_v15 }
 0x52d   : > { %1796 = vmatmul.msk.f32.vlgmr.msra.gmra.mxu3 %vm396_vm1, %v1233_v27  ;;  %1591 = vmatpush.msra.mxu2 %v1562_v42 }
 0x52e   : > { %1362 = vmatpush.msrb.mxu3 %v2226_v52  ;;  %v1448_v52 = vsel %vm267_vm0, %v1446_v49, 0.0 }
 0x52f   : > { %v1449_v51 = vrot.slane %v1448_v52, 4  ;;  %1592 = vmatpush.msra.mxu2 %v1561_v43 }
 0x530   : > { %1431 = vmatpush.msra.mxu3 %v2234_v61  ;;  %v1473_v61 = vsel %vm267_vm0, %v1471_v50, 0.0 }
 0x531   : > { %v1450_v54 = vadd.f32 %v1449_v51, %v1448_v52  ;;  %v1474_v55 = vrot.slane %v1473_v61, 4 }
 0x533   : > { %v1451_v58 = vrot.slane %v1450_v54, 2  ;;  %v1475_v60 = vadd.f32 %v1474_v55, %v1473_v61 }
 0x535   : > { %v1452_v62 = vadd.f32 %v1451_v58, %v1450_v54  ;;  %v1476_v63 = vrot.slane %v1475_v60, 2 }
 0x537   : > { %v1453_v2 = vrot.slane %v1452_v62, 1  ;;  %v1477_v1 = vadd.f32 %v1476_v63, %v1475_v60 }
 0x539   : > { %v1454_v4 = vadd.f32 %v1453_v2, %v1452_v62  ;;  %v1478_v28 = vrot.slane %v1477_v1, 1 }
 0x53b   : > { %v1469_v59 = vmul.f32 %v2306_v40, %v1454_v4  ;;  %v1479_v5 = vadd.f32 %v1478_v28, %v1477_v1 }
 0x53d   : > { %v1487_v6 = vmul.f32 %v1479_v5, %v2306_v40  ;;  %v1489_v7 = vmul.f32 %v1469_v59, %v1469_v59  ;;  %v1493_v24 = vsub.f32 %v1446_v49, %v1469_v59 }
 0x53f   : > { %v1491_v8 = vsub.f32 %v1487_v6, %v1489_v7 }
 0x541   : > { %v1495_v9 = vadd.f32 1e-05, %v1491_v8 }
 0x543   : > { %1905 = vrsqrt.f32 %v1495_v9  ;;  %vm1503_vm8 = vweird.f32 %v1495_v9 }
 0x549   : > { %v1906_v14 = vpop.eup %1905 }
 0x54a   : > { %v1498_v16 = vmul.f32 %v1906_v14, %v1495_v9  ;;  %vm1504_vm7 = vweird.f32 %v1906_v14 }
 0x54b   : > { %vm1505_vm9 = vmor %vm1503_vm8, %vm1504_vm7 }
 0x54c   : > { %v1499_v17 = vmul.f32 %v1906_v14, %v1498_v16 }
 0x54e   : > { %v1500_v19 = vmul.f32 0.5, %v1499_v17 }
 0x550   : > { %v1501_v22 = vsub.f32 1.5, %v1500_v19 }
 0x552   : > { %v1502_v41 = vmul.f32 %v1906_v14, %v1501_v22 }
 0x554   : > { %v1506_v23 = vsel %vm1505_vm9, %v1906_v14, %v1502_v41 }
 0x555   : > { %v1517_v25 = vmul.f32 %v1506_v23, %v1493_v24 }
 0x557   : > { %v1520_v31 = vmul.f32 %v1519_v29, %v1517_v25  ;;  %v1569_v25 = vperm.slane %v2297_v46, 4 }
 0x559   : > { %v2332_v33 = vadd.f32 %v1522_v32, %v1520_v31 }
 0x592   : > { %v1260_v12 = vpop.f32.mrf.mxu2 }
 0x593   : > { %1801 = vmatmul.msk.f32.vlgmr.msrb.gmra.mxu3 %vm396_vm1, %v1260_v12 }
 0x59f   : > { %v1341_v18 = vpop.f32.mrf.mxu2 }
 0x5a0   : > { %1804 = vmatmul.msk.f32.vlgmr.msra.gmra.mxu3 %vm396_vm1, %v1341_v18 }
 0x5a2   : > { %v1314_v21 = vpop.f32.mrf.mxu1 }
 0x5a3   : > { %1803 = vmatmul.msk.f32.vlgmr.msrb.gmra.mxu2 %vm396_vm1, %v1314_v21 }
 0x5b0   : > { %v1287_v30 = vpop.f32.mrf.mxu3 }
 0x5b1   : > { %1802 = vmatmul.msk.f32.vlgmr.msrb.gmra.mxu1 %vm396_vm1, %v1287_v30  ;;  %vm1570_vm1 = vcmask 523264  }
 0x5b9   : > { %1805 = vmatmul.msk.f32.vlgmr.msra.gmra.mxu1 %vm267_vm0, %v2332_v33 }
 0x616   : > { %v1364_v44 = vpop.f32.mrf.mxu3 }
 0x617   : > { %v1436_v48 = vsel %vm267_vm0, %v1364_v44, 0.0 }
 0x623   : > { %v1433_v45 = vpop.f32.mrf.mxu3 }
 0x624   : > { %v1441_v61 = vsel %vm267_vm0, %v1433_v45, 0.0 }
 0x626   : > { %v1410_v26 = vpop.f32.mrf.mxu2 }
 0x627   : > { %v1439_v50 = vsel %vm267_vm0, %v1410_v26, 0.0 }
 0x62e   : > { %v1387_v27 = vpop.f32.mrf.mxu1 }
 0x62f   : > { %v1437_v49 = vsel %vm267_vm0, %v1387_v27, 0.0 }
 0x630   : > { %v1438_v52 = vadd.f32 %v1437_v49, %v1436_v48 }
 0x632   : > { %v1440_v51 = vadd.f32 %v1439_v50, %v1438_v52 }
 0x634   : > { %v1442_v54 = vadd.f32 %v1441_v61, %v1440_v51 }
 0x636   : > { %v1445_v55 = vadd.f32 %v1443_v47, %v1442_v54  ;;  %v1553_v57 = vpop.f32.mrf.mxu1 }
 0x637   : > { %v1554_v58 = vadd.f32 %v1553_v57, %v1529_v53 }
 0x638   : > { %v1447_v60 = vadd.f32 %v1445_v55, %v2068_v0 }
 0x639   : > { %v1559_v56 = vmax.f32 %v1554_v58, 0.0 }
 0x63a   : > { %v1455_v62 = vsel %vm267_vm0, %v1447_v60, 0.0  ;;  %v1472_v63 = vmul.f32 %v1447_v60, %v1447_v60 }
 0x63b   : > { %v1456_v20 = vrot.slane %v1455_v62, 4  ;;  %1807 = vmatmul.msk.f32.vlgmr.msra.gmra.mxu2 %vm1570_vm1, %v1559_v56 }
 0x63c   : > { %v1480_v2 = vsel %vm267_vm0, %v1472_v63, 0.0 }
 0x63d   : > { %v1457_v1 = vadd.f32 %v1456_v20, %v1455_v62  ;;  %v1481_v3 = vrot.slane %v1480_v2, 4 }
 0x63f   : > { %v1458_v4 = vrot.slane %v1457_v1, 2  ;;  %v1482_v47 = vadd.f32 %v1481_v3, %v1480_v2 }
 0x641   : > { %v1483_v28 = vrot.slane %v1482_v47, 2  ;;  %v1459_v59 = vadd.f32 %v1458_v4, %v1457_v1  ;;  %v1666_v1 = vperm.slane %v2297_v46, 5 }
 0x643   : > { %v1484_v5 = vadd.f32 %v1483_v28, %v1482_v47  ;;  %v1460_v6 = vrot.slane %v1459_v59, 1  ;;  %v1669_v47 = vperm.slane %v2297_v46, 6 }
 0x645   : > { %v1485_v7 = vrot.slane %v1484_v5, 1  ;;  %v1461_v0 = vadd.f32 %v1460_v6, %v1459_v59 }
 0x647   : > { %v1470_v8 = vmul.f32 %v2306_v40, %v1461_v0  ;;  %v1486_v9 = vadd.f32 %v1485_v7, %v1484_v5 }
 0x649   : > { %v1488_v10 = vmul.f32 %v1486_v9, %v2306_v40  ;;  %v1490_v11 = vmul.f32 %v1470_v8, %v1470_v8  ;;  %v1494_v21 = vsub.f32 %v1447_v60, %v1470_v8 }
 0x64b   : > { %v1492_v12 = vsub.f32 %v1488_v10, %v1490_v11 }
 0x64d   : > { %v1496_v13 = vadd.f32 1e-05, %v1492_v12 }
 0x64f   : > { %1907 = vrsqrt.f32 %v1496_v13  ;;  %vm1513_vm11 = vweird.f32 %v1496_v13 }
 0x655   : > { %v1908_v14 = vpop.eup %1907 }
 0x656   : > { %v1508_v15 = vmul.f32 %v1908_v14, %v1496_v13  ;;  %vm1514_vm10 = vweird.f32 %v1908_v14 }
 0x657   : > { %vm1515_vm12 = vmor %vm1513_vm11, %vm1514_vm10 }
 0x658   : > { %v1509_v16 = vmul.f32 %v1908_v14, %v1508_v15 }
 0x65a   : > { %v1510_v17 = vmul.f32 0.5, %v1509_v16 }
 0x65c   : > { %v1511_v18 = vsub.f32 1.5, %v1510_v17 }
 0x65e   : > { %v1512_v19 = vmul.f32 %v1908_v14, %v1511_v18 }
 0x660   : > { %v1516_v22 = vsel %vm1515_vm12, %v1908_v14, %v1512_v19 }
 0x661   : > { %v1518_v41 = vmul.f32 %v1516_v22, %v1494_v21 }
 0x663   : > { %v1521_v23 = vmul.f32 %v1519_v29, %v1518_v41 }
 0x665   : > { %v1524_v24 = vadd.f32 %v1522_v32, %v1521_v23 }
 0x667   : > { %1806 = vmatmul.msk.f32.gmra.mxu1 %vm267_vm0, %v1524_v24 }
 0x6be   : > { %v1594_v30 = vpop.f32.mrf.mxu2 }
 0x6bf   : > { %v1595_v31 = vadd.f32 %v1594_v30, %v1569_v25 }
 0x6c1   : > { %v1600_v34 = vadd.f32 %v1595_v31, %v2332_v33 }
 0x6c3   : > { %v1602_v35 = vsel %vm267_vm0, %v1600_v34, 0.0  ;;  %v1618_v36 = vmul.f32 %v1600_v34, %v1600_v34 }
 0x6c4   : > { %v1603_v37 = vrot.slane %v1602_v35, 4 }
 0x6c5   : > { %v1620_v38 = vsel %vm267_vm0, %v1618_v36, 0.0 }
 0x6c6   : > { %v1604_v39 = vadd.f32 %v1603_v37, %v1602_v35  ;;  %v1621_v42 = vrot.slane %v1620_v38, 4 }
 0x6c8   : > { %v1605_v29 = vrot.slane %v1604_v39, 2  ;;  %v1622_v43 = vadd.f32 %v1621_v42, %v1620_v38 }
 0x6ca   : > { %v1606_v44 = vadd.f32 %v1605_v29, %v1604_v39  ;;  %v1623_v32 = vrot.slane %v1622_v43, 2 }
 0x6cc   : > { %v1607_v26 = vrot.slane %v1606_v44, 1  ;;  %v1624_v27 = vadd.f32 %v1623_v32, %v1622_v43 }
 0x6ce   : > { %v1608_v48 = vadd.f32 %v1607_v26, %v1606_v44  ;;  %v1625_v49 = vrot.slane %v1624_v27, 1 }
 0x6d0   : > { %v1616_v45 = vmul.f32 %v1608_v48, %v2306_v40  ;;  %v1626_v52 = vadd.f32 %v1625_v49, %v1624_v27 }
 0x6d2   : > { %v1634_v33 = vmul.f32 %v1626_v52, %v2306_v40  ;;  %v1636_v50 = vmul.f32 %v1616_v45, %v1616_v45  ;;  %v1640_v2 = vsub.f32 %v1600_v34, %v1616_v45 }
 0x6d4   : > { %v1638_v51 = vsub.f32 %v1634_v33, %v1636_v50 }
 0x6d6   : > { %v1642_v61 = vadd.f32 1e-05, %v1638_v51 }
 0x6d8   : > { %1909 = vrsqrt.f32 %v1642_v61  ;;  %vm1650_vm14 = vweird.f32 %v1642_v61 }
 0x6de   : > { %v1910_v54 = vpop.eup %1909 }
 0x6df   : > { %v1645_v55 = vmul.f32 %v1910_v54, %v1642_v61  ;;  %vm1651_vm13 = vweird.f32 %v1910_v54 }
 0x6e0   : > { %vm1652_vm15 = vmor %vm1650_vm14, %vm1651_vm13 }
 0x6e1   : > { %v1646_v57 = vmul.f32 %v1910_v54, %v1645_v55 }
 0x6e3   : > { %v1647_v58 = vmul.f32 0.5, %v1646_v57 }
 0x6e4   : > { %v1556_v60 = vpop.f32.mrf.mxu1 }
 0x6e5   : > { %v1648_v56 = vsub.f32 1.5, %v1647_v58  ;;  %v1557_v62 = vadd.f32 %v1556_v60, %v1529_v53 }
 0x6e7   : > { %v1649_v63 = vmul.f32 %v1910_v54, %v1648_v56  ;;  %v1560_v20 = vmax.f32 %v1557_v62, 0.0 }
 0x6e9   : > { %v1653_v3 = vsel %vm1652_vm15, %v1910_v54, %v1649_v63  ;;  %1808 = vmatmul.msk.f32.gmra.mxu2 %vm1570_vm1, %v1560_v20 }
 0x6ea   : > { %v1664_v4 = vmul.f32 %v1653_v3, %v1640_v2 }
 0x6ec   : > { %v1667_v28 = vmul.f32 %v1666_v1, %v1664_v4 }
 0x6ee   : > { %v1670_v59 = vadd.f32 %v1669_v47, %v1667_v28 }
 0x6f0   : > { %1672 = vst.msk [vmem:[%s2394_s15] sm:$0xff] %vm267_vm0, %v1670_v59 }
 0x76c   : > { %v1597_v53 = vpop.f32.mrf.mxu2 }
 0x76d   : > { %v1598_v5 = vadd.f32 %v1597_v53, %v1569_v25 }
 0x76f   : > { %v1601_v6 = vadd.f32 %v1598_v5, %v1524_v24 }
 0x771   : > { %v1609_v7 = vsel %vm267_vm0, %v1601_v6, 0.0  ;;  %v1619_v0 = vmul.f32 %v1601_v6, %v1601_v6 }
 0x772   : > { %v1610_v8 = vrot.slane %v1609_v7, 4 }
 0x773   : > { %v1627_v9 = vsel %vm267_vm0, %v1619_v0, 0.0 }
 0x774   : > { %v1611_v10 = vadd.f32 %v1610_v8, %v1609_v7  ;;  %v1628_v46 = vrot.slane %v1627_v9, 4 }
 0x776   : > { %v1612_v11 = vrot.slane %v1611_v10, 2  ;;  %v1629_v12 = vadd.f32 %v1628_v46, %v1627_v9 }
 0x778   : > { %v1613_v13 = vadd.f32 %v1612_v11, %v1611_v10  ;;  %v1630_v14 = vrot.slane %v1629_v12, 2 }
 0x77a   : > { %v1614_v15 = vrot.slane %v1613_v13, 1  ;;  %v1631_v16 = vadd.f32 %v1630_v14, %v1629_v12 }
 0x77c   : > { %v1615_v17 = vadd.f32 %v1614_v15, %v1613_v13  ;;  %v1632_v18 = vrot.slane %v1631_v16, 1 }
 0x77e   : > { %v1617_v19 = vmul.f32 %v1615_v17, %v2306_v40  ;;  %v1633_v21 = vadd.f32 %v1632_v18, %v1631_v16 }
 0x780   : > { %v1635_v22 = vmul.f32 %v1633_v21, %v2306_v40  ;;  %v1637_v41 = vmul.f32 %v1617_v19, %v1617_v19  ;;  %v1641_v40 = vsub.f32 %v1601_v6, %v1617_v19 }
 0x782   : > { %v1639_v23 = vsub.f32 %v1635_v22, %v1637_v41 }
 0x784   : > { %v1643_v24 = vadd.f32 1e-05, %v1639_v23 }
 0x786   : > { %1911 = vrsqrt.f32 %v1643_v24  ;;  %vm1660_vm3 = vweird.f32 %v1643_v24 }
 0x78c   : > { %v1912_v25 = vpop.eup %1911 }
 0x78d   : > { %v1655_v30 = vmul.f32 %v1912_v25, %v1643_v24  ;;  %vm1661_vm2 = vweird.f32 %v1912_v25 }
 0x78e   : > { %vm1662_vm4 = vmor %vm1660_vm3, %vm1661_vm2 }
 0x78f   : > { %v1656_v31 = vmul.f32 %v1912_v25, %v1655_v30 }
 0x791   : > { %v1657_v34 = vmul.f32 0.5, %v1656_v31 }
 0x793   : > { %v1658_v35 = vsub.f32 1.5, %v1657_v34 }
 0x795   : > { %v1659_v36 = vmul.f32 %v1912_v25, %v1658_v35 }
 0x797   : > { %v1663_v37 = vsel %vm1662_vm4, %v1912_v25, %v1659_v36 }
 0x798   : > { %v1665_v38 = vmul.f32 %v1663_v37, %v1641_v40 }
 0x79a   : > { %v1668_v39 = vmul.f32 %v1666_v1, %v1665_v38 }
 0x79c   : > { %v1671_v42 = vadd.f32 %v1669_v47, %v1668_v39 }
 0x79e   : > { %1673 = vst.msk [vmem:[%s2394_s15 + $0x8] sm:$0xff] %vm267_vm0, %v1671_v42 }
 0x79f   : > { %1940 = shalt.err (!%p1937_p3)
}
 0x7a0   : > { %s1979_s13 = smov 128   ;;  %s1980_s15 = smov 8  }
 0x7a1   : > { %1817 = dma.vmem_to_hbm [thread:$0]  (%p2054_p5), %s1688_s20, 256, %s1690_s26, %s1675_s25, %s1979_s13, %s1979_s13, %s1980_s15  }
 0x7a2 PF: > { %p1823_p4 = scmp.ge.s32.totalorder %s1975_s24, 2  ;;  %s1704_s16 = sand.u32 1, %s1963_s21  }
 0x7a3   : > { %s1705_s17 = scalar_lea.sflag [#allocation3], %s1704_s16 }
 0x7a4   : > { %p1820_p7 = pnand %p1823_p4, %p2058_p6 }
 0x7a6   : > { %p1821_p8 = pneg %p1820_p7 }
 0x7a8   : > { %1958 = dma.done.wait (%p1821_p8), %s1705_s17, 256  }
 0x7a9   : > { %1960 = vsyncadd (%p1821_p8), %s1705_s17, 4294967040  ;;  %p16_p9 = scmp.ge.s32.totalorder %s2041_s27, 4   ;;  %s2447_s21 = smov %s1967_s22 }
 0x7aa   : > { %s2448_s22 = smov %s1971_s23  ;;  %s2449_s23 = smov %s2052_s30 }
 0x7ab   : > { %s2450_s24 = smov %s2041_s27  ;;  %18 = sbr.rel (!%p16_p9) target bundleno = 3 (0x3), region = 79 }
 0x7b0   :  { %1711 = vsyncpa [#allocation3], 1 }
 0x7b1   :  { %1713 = vsyncpa [#allocation3 + $0x1], 1 }

</bundles_post_ra>
